<compile_context>
chip_gen: v6e
topology: v6e:2x2x1
jax: 0.10.0
libtpu: 0.0.40
codegen_flags: <defaults>
</compile_context>

<pallas_src>
import functools

import jax
import jax.numpy as jnp
import numpy as np
from jax.experimental import pallas as pl
from jax.experimental.pallas import tpu as pltpu

IGNORE_INDEX = -1      # Meta.config['learner_config']['ignore_index']
_NEG = -1.0e30         # big-negative mask value (avoids inf-inf NaNs)


def _round_up(x, m):
    return ((x + m - 1) // m) * m


# ----------------------------------------------------------------------------
# Fused Pallas kernel: shared Linear+ReLU -> all heads -> softmax + masked CE
# ----------------------------------------------------------------------------
def _fused_mtl_kernel(x_ref, w1_ref, b1_ref, wh_ref, bh_ref, y_ref,
                      prob_ref, stats_ref, *, task_metas):
    # Shared feature module: ReLU(x @ W1 + b1); bf16 MXU, f32 accumulate.
    xb = x_ref[...].astype(jnp.bfloat16)
    h = jnp.dot(xb, w1_ref[...], preferred_element_type=jnp.float32)
    feat = jnp.maximum(h + b1_ref[...], 0.0)                       # (TB, H) f32

    # All task heads in a single MXU pass against the concatenated/padded RHS.
    logits = jnp.dot(feat.astype(jnp.bfloat16), wh_ref[...],
                     preferred_element_type=jnp.float32) + bh_ref[...]  # (TB, Cpad)

    tb, cpad = logits.shape
    lane = jax.lax.broadcasted_iota(jnp.int32, (tb, cpad), 1)

    n_tasks = len(task_metas)
    sr = max(8, _round_up(2 * n_tasks, 8))
    rows = jax.lax.broadcasted_iota(jnp.int32, (sr, 128), 0)

    probs_all = jnp.zeros((tb, cpad), jnp.float32)
    stats = jnp.zeros((sr, 128), jnp.float32)

    for t, (off, ncls) in enumerate(task_metas):
        tmask = (lane >= off) & (lane < off + ncls)
        ml = jnp.where(tmask, logits, _NEG)
        m = jnp.max(ml, axis=-1, keepdims=True)                    # (TB, 1)
        e = jnp.exp(ml - m)                                        # 0 on padded lanes
        s = jnp.sum(e, axis=-1, keepdims=True)                     # (TB, 1)
        probs_all = probs_all + e * pl.reciprocal(s, approx=False)  # disjoint segments

        y = y_ref[t]                                               # (TB, 1) int32
        active = (y != IGNORE_INDEX).astype(jnp.float32)           # (TB, 1)
        # gold logit via masked sum (no full log-prob materialization)
        gold = jnp.sum(jnp.where(lane == (off + y), logits, 0.0),
                       axis=-1, keepdims=True)                     # (TB, 1)
        nll = -(gold - m - jnp.log(s))                             # (TB, 1)
        nll_sum = jnp.sum(nll * active)
        count = jnp.sum(active)
        stats = jnp.where(rows == 2 * t, nll_sum, stats)
        stats = jnp.where(rows == 2 * t + 1, count, stats)

    prob_ref[...] = probs_all          # lane-dense (TB, 128) store
    stats_ref[0] = stats               # lane-dense (SR, 128) store


# ----------------------------------------------------------------------------
# Jitted wrapper: one pallas_call per forward, tiny epilogue for the losses
# ----------------------------------------------------------------------------
@functools.partial(jax.jit, static_argnames=("task_metas",))
def _fused_forward(x, w1, b1, wh, bh, y_stack, *, task_metas):
    B, D = x.shape
    H = w1.shape[1]
    Cpad = wh.shape[1]
    T = y_stack.shape[0]
    n_tasks = len(task_metas)
    sr = max(8, _round_up(2 * n_tasks, 8))

    # Batch tiling: multiples of 16 (bf16 sublane packing); grid over B.
    tb = 128 if B >= 128 else _round_up(max(B, 8), 16)
    B_pad = _round_up(B, tb)
    if B_pad != B:
        x = jnp.pad(x, ((0, B_pad - B), (0, 0)))
        y_stack = jnp.pad(y_stack, ((0, 0), (0, B_pad - B), (0, 0)),
                          constant_values=IGNORE_INDEX)
    nb = B_pad // tb

    kern = functools.partial(_fused_mtl_kernel, task_metas=task_metas)
    probs, stats = pl.pallas_call(
        kern,
        out_shape=(
            jax.ShapeDtypeStruct((B_pad, Cpad), jnp.float32),
            jax.ShapeDtypeStruct((nb, sr, 128), jnp.float32),
        ),
        grid=(nb,),
        in_specs=[
            pl.BlockSpec((tb, D), lambda i: (i, 0)),           # x: streamed per block
            pl.BlockSpec((D, H), lambda i: (0, 0)),            # shared W: resident
            pl.BlockSpec((1, H), lambda i: (0, 0)),
            pl.BlockSpec((H, Cpad), lambda i: (0, 0)),         # concat head W: resident
            pl.BlockSpec((1, Cpad), lambda i: (0, 0)),
            pl.BlockSpec((T, tb, 1), lambda i: (0, i, 0)),     # labels, all tasks
        ],
        out_specs=(
            pl.BlockSpec((tb, Cpad), lambda i: (i, 0)),        # lane-dense probs slab
            pl.BlockSpec((1, sr, 128), lambda i: (i, 0, 0)),   # per-block loss stats
        ),
        compiler_params=pltpu.CompilerParams(
            dimension_semantics=("parallel",)),                # megacore on v7x
    )(x, w1, b1, wh, bh, y_stack)

    # Tiny finalize (nb x T values): masked-mean CE per task.
    losses = []
    for t in range(n_tasks):
        nll_sum = jnp.sum(stats[:, 2 * t, 0])
        count = jnp.sum(stats[:, 2 * t + 1, 0])
        losses.append(nll_sum / jnp.maximum(count, 1.0))
    return probs[:B], jnp.stack(losses)


# ----------------------------------------------------------------------------
# EmmentalModel equivalent
# ----------------------------------------------------------------------------
class EmmentalModelJax:
    """Mirror of EmmentalModel.forward for a synthetic multi-task network.

    module_pool = {"shared": Linear(D,H)+ReLU, "head_<task>": Linear(H,C_t)}
    task_flow   = [_input_ -> shared -> head_<task>]
    loss_func   = masked-mean cross-entropy   (inside the fused Pallas kernel)
    output_func = softmax                     (inside the fused Pallas kernel)
    """

    def __init__(self, name, in_dim, hidden_dim, task_classes, key):
        self.name = name
        self.task_names = set(task_classes.keys())
        self.task_order = sorted(task_classes.keys())
        self.task_index = {t: i for i, t in enumerate(self.task_order)}

        n_tasks = len(self.task_order)
        keys = jax.random.split(key, 2 + 2 * n_tasks)
        scale = 0.1

        w1 = scale * jax.random.normal(keys[0], (in_dim, hidden_dim), jnp.float32)
        b1 = scale * jax.random.normal(keys[1], (1, hidden_dim), jnp.float32)
        self.w1 = w1.astype(jnp.bfloat16)       # bf16 matmul weights
        self.b1 = b1                            # f32 bias
        self.module_pool = {"shared": {"w": self.w1, "b": self.b1}}

        c_total = sum(task_classes.values())
        cpad = max(128, _round_up(c_total, 128))   # lane-dense output slab
        wh = jnp.zeros((hidden_dim, cpad), jnp.bfloat16)
        bh = jnp.zeros((1, cpad), jnp.float32)

        metas = []
        off = 0
        for i, tname in enumerate(self.task_order):
            ncls = task_classes[tname]
            kw, kb = keys[2 + 2 * i], keys[3 + 2 * i]
            w = (scale * jax.random.normal(kw, (hidden_dim, ncls),
                                           jnp.float32)).astype(jnp.bfloat16)
            b = scale * jax.random.normal(kb, (1, ncls), jnp.float32)
            self.module_pool[f"head_{tname}"] = {"w": w, "b": b}
            wh = wh.at[:, off:off + ncls].set(w)
            bh = bh.at[:, off:off + ncls].set(b)
            metas.append((off, ncls))
            off += ncls
        self.wh = wh
        self.bh = bh
        self.task_metas = tuple(metas)          # static -> jit/kernel specialization

    # task_flow / output_func / loss_func are all fused into one pallas_call.
    def forward(self, uids, X_dict, Y_dict, task_to_label_dict):
        x = X_dict["data"]
        B = x.shape[0]
        T = len(self.task_order)

        # Assemble the (T, B, 1) label stack on host (labels already live here,
        # as in the PyTorch code); missing tasks stay fully ignored.
        y_np = np.full((T, B, 1), IGNORE_INDEX, np.int32)
        host_labels = {}
        for task_name, label_name in task_to_label_dict.items():
            if task_name not in self.task_index:
                continue
            lbl = np.asarray(Y_dict[label_name], np.int32)
            y_np[self.task_index[task_name], :, 0] = lbl
            host_labels[task_name] = lbl
        y_stack = jnp.asarray(y_np)

        # Single fused launch; single device->host sync.
        probs_slab, loss_vec = jax.block_until_ready(_fused_forward(
            x, self.w1, self.b1, self.wh, self.bh, y_stack,
            task_metas=self.task_metas))
        probs_np = np.asarray(probs_slab)
        loss_np = np.asarray(loss_vec)

        uid_dict, loss_dict, prob_dict, gold_dict = {}, {}, {}, {}
        for task_name, lbl in host_labels.items():
            active = lbl != IGNORE_INDEX
            if not active.any():
                continue
            t = self.task_index[task_name]
            off, ncls = self.task_metas[t]
            uid_dict[task_name] = [u for u, a in zip(uids, active) if a]
            loss_dict[task_name] = loss_np[t]
            prob_dict[task_name] = probs_np[active][:, off:off + ncls]
            gold_dict[task_name] = lbl[active]
        return uid_dict, loss_dict, prob_dict, gold_dict


# ----------------------------------------------------------------------------
if __name__ == "__main__":
    key = jax.random.PRNGKey(0)
    k_model, k_x, k_y1, k_y2 = jax.random.split(key, 4)

    B, D, H = 16, 32, 128
    task_classes = {"task1": 8, "task2": 4}

    model = EmmentalModelJax("EmmentalModel", D, H, task_classes, k_model)

    x = jax.random.normal(k_x, (B, D), jnp.float32)
    y1 = jax.random.randint(k_y1, (B,), 0, task_classes["task1"], jnp.int32)
    y2 = jax.random.randint(k_y2, (B,), 0, task_classes["task2"], jnp.int32)
    # mark a couple of examples as ignored (ignore_index = -1)
    y1 = y1.at[0].set(IGNORE_INDEX)
    y2 = y2.at[3].set(IGNORE_INDEX)

    uids = [f"uid_{i}" for i in range(B)]
    X_dict = {"data": x}
    Y_dict = {"task1_labels": y1, "task2_labels": y2}
    task_to_label_dict = {"task1": "task1_labels", "task2": "task2_labels"}

    uid_d, loss_d, prob_d, gold_d = model.forward(
        uids, X_dict, Y_dict, task_to_label_dict)

    # Sanity checks vs. a pure-JAX reference using the SAME bf16 matmul path.
    xb = x.astype(jnp.bfloat16)
    feat_ref = jnp.maximum(
        jnp.dot(xb, model.w1, preferred_element_type=jnp.float32) + model.b1, 0.0)
    fb = feat_ref.astype(jnp.bfloat16)
    for tname in ("task1", "task2"):
        head = model.module_pool[f"head_{tname}"]
        logits_ref = jnp.dot(fb, head["w"],
                             preferred_element_type=jnp.float32) + head["b"]
        probs_ref = jax.nn.softmax(logits_ref, axis=-1)
        logp_ref = jax.nn.log_softmax(logits_ref, axis=-1)
        y = np.asarray(Y_dict[f"{tname}_labels"])
        active = y != IGNORE_INDEX
        np.testing.assert_allclose(
            prob_d[tname], np.asarray(probs_ref)[active], rtol=1e-3, atol=1e-4)
        nll_ref = -np.asarray(logp_ref)[active, y[active]]
        np.testing.assert_allclose(
            float(loss_d[tname]), nll_ref.mean(), rtol=1e-3, atol=1e-4)
        assert gold_d[tname].shape[0] == active.sum()
        assert len(uid_d[tname]) == active.sum()

    jax.block_until_ready(jnp.asarray(float(loss_d["task1"])))
    print("KERNEL_OK")
</pallas_src>

<mosaic_0001>
module attributes {stable_mosaic.version = 11 : i64} {
  func.func @_fused_mtl_kernel(%arg0: i32, %arg1: memref<16x32xf32, #tpu.memory_space<vmem>>, %arg2: memref<32x128xbf16, #tpu.memory_space<vmem>>, %arg3: memref<1x128xf32, #tpu.memory_space<vmem>>, %arg4: memref<128x128xbf16, #tpu.memory_space<vmem>>, %arg5: memref<1x128xf32, #tpu.memory_space<vmem>>, %arg6: memref<2x16x1xi32, #tpu.memory_space<vmem>>, %arg7: memref<16x128xf32, #tpu.memory_space<vmem>>, %arg8: memref<1x8x128xf32, #tpu.memory_space<vmem>>) attributes {dimension_semantics = [#tpu.dimension_semantics<parallel>], iteration_bounds = array<i64: 1>, scalar_prefetch = 0 : i64, scratch_operands = 0 : i64, tpu.core_type = #tpu.core_type<tc>, window_params = [{transform_indices = @transform_0, window_bounds = array<i64: 16, 32>}, {pipeline_mode = #tpu.pipeline_mode<synchronous>, transform_indices = @transform_1, window_bounds = array<i64: 32, 128>}, {pipeline_mode = #tpu.pipeline_mode<synchronous>, transform_indices = @transform_2, window_bounds = array<i64: 1, 128>}, {pipeline_mode = #tpu.pipeline_mode<synchronous>, transform_indices = @transform_3, window_bounds = array<i64: 128, 128>}, {pipeline_mode = #tpu.pipeline_mode<synchronous>, transform_indices = @transform_4, window_bounds = array<i64: 1, 128>}, {transform_indices = @transform_5, window_bounds = array<i64: 2, 16, 1>}, {transform_indices = @transform_6, window_bounds = array<i64: 16, 128>}, {transform_indices = @transform_7, window_bounds = array<i64: 1, 8, 128>}]} {
    %c0 = arith.constant 0 : index
    %c0_0 = arith.constant 0 : index
    %0 = vector.load %arg1[%c0, %c0_0] : memref<16x32xf32, #tpu.memory_space<vmem>>, vector<16x32xf32>
    %1 = arith.truncf %0 : vector<16x32xf32> to vector<16x32xbf16>
    %c0_1 = arith.constant 0 : index
    %c0_2 = arith.constant 0 : index
    %2 = vector.load %arg2[%c0_1, %c0_2] : memref<32x128xbf16, #tpu.memory_space<vmem>>, vector<32x128xbf16>
    %cst = arith.constant dense<0.000000e+00> : vector<16x128xf32>
    %3 = tpu.matmul %1, %2, %cst {dimension_numbers = #tpu.dot_dimension_numbers<[1], [0], [0], [1], [0, 0, 1, 1], [], []>} : vector<16x32xbf16>, vector<32x128xbf16>, vector<16x128xf32> -> vector<16x128xf32>
    %c0_3 = arith.constant 0 : index
    %c0_4 = arith.constant 0 : index
    %4 = vector.load %arg3[%c0_3, %c0_4] : memref<1x128xf32, #tpu.memory_space<vmem>>, vector<1x128xf32>
    %5 = vector.broadcast %4 : vector<1x128xf32> to vector<16x128xf32>
    %6 = arith.addf %3, %5 : vector<16x128xf32>
    %cst_5 = arith.constant 0.000000e+00 : f32
    %7 = vector.broadcast %cst_5 : f32 to vector<16x128xf32>
    %8 = arith.maximumf %6, %7 : vector<16x128xf32>
    %9 = arith.truncf %8 : vector<16x128xf32> to vector<16x128xbf16>
    %c0_6 = arith.constant 0 : index
    %c0_7 = arith.constant 0 : index
    %10 = vector.load %arg4[%c0_6, %c0_7] : memref<128x128xbf16, #tpu.memory_space<vmem>>, vector<128x128xbf16>
    %cst_8 = arith.constant dense<0.000000e+00> : vector<16x128xf32>
    %11 = tpu.matmul %9, %10, %cst_8 {dimension_numbers = #tpu.dot_dimension_numbers<[1], [0], [0], [1], [0, 0, 1, 1], [], []>} : vector<16x128xbf16>, vector<128x128xbf16>, vector<16x128xf32> -> vector<16x128xf32>
    %c0_9 = arith.constant 0 : index
    %c0_10 = arith.constant 0 : index
    %12 = vector.load %arg5[%c0_9, %c0_10] : memref<1x128xf32, #tpu.memory_space<vmem>>, vector<1x128xf32>
    %13 = vector.broadcast %12 : vector<1x128xf32> to vector<16x128xf32>
    %14 = arith.addf %11, %13 : vector<16x128xf32>
    %15 = tpu.iota {dimensions = array<i32: 1>} : vector<16x128xi32>
    %16 = tpu.iota {dimensions = array<i32: 0>} : vector<8x128xi32>
    %cst_11 = arith.constant 0.000000e+00 : f32
    %17 = vector.broadcast %cst_11 : f32 to vector<16x128xf32>
    %cst_12 = arith.constant 0.000000e+00 : f32
    %18 = vector.broadcast %cst_12 : f32 to vector<8x128xf32>
    %c0_i32 = arith.constant 0 : i32
    %19 = vector.broadcast %c0_i32 : i32 to vector<16x128xi32>
    %20 = arith.cmpi sge, %15, %19 : vector<16x128xi32>
    %c8_i32 = arith.constant 8 : i32
    %21 = vector.broadcast %c8_i32 : i32 to vector<16x128xi32>
    %22 = arith.cmpi slt, %15, %21 : vector<16x128xi32>
    %23 = arith.andi %20, %22 : vector<16x128xi1>
    %cst_13 = arith.constant -1.000000e+30 : f32
    %24 = vector.broadcast %cst_13 : f32 to vector<16x128xf32>
    %25 = arith.select %23, %14, %24 : vector<16x128xi1>, vector<16x128xf32>
    %cst_14 = arith.constant dense<0xFF800000> : vector<16xf32>
    %26 = vector.multi_reduction <maximumf>, %25, %cst_14 [1] : vector<16x128xf32> to vector<16xf32>
    %27 = vector.shape_cast %26 : vector<16xf32> to vector<16x1xf32>
    %28 = vector.broadcast %27 : vector<16x1xf32> to vector<16x128xf32>
    %29 = arith.subf %25, %28 : vector<16x128xf32>
    %30 = math.exp %29 : vector<16x128xf32>
    %cst_15 = arith.constant dense<0.000000e+00> : vector<16xf32>
    %31 = vector.multi_reduction <add>, %30, %cst_15 [1] : vector<16x128xf32> to vector<16xf32>
    %32 = vector.shape_cast %31 : vector<16xf32> to vector<16x1xf32>
    %33 = tpu.reciprocal %32 : vector<16x1xf32> -> vector<16x1xf32>
    %34 = vector.broadcast %33 : vector<16x1xf32> to vector<16x128xf32>
    %35 = arith.mulf %30, %34 : vector<16x128xf32>
    %36 = arith.addf %17, %35 : vector<16x128xf32>
    %c0_16 = arith.constant 0 : index
    %c0_17 = arith.constant 0 : index
    %c0_18 = arith.constant 0 : index
    %37 = vector.load %arg6[%c0_16, %c0_17, %c0_18] : memref<2x16x1xi32, #tpu.memory_space<vmem>>, vector<1x16x1xi32>
    %38 = vector.shape_cast %37 : vector<1x16x1xi32> to vector<16x1xi32>
    %c-1_i32 = arith.constant -1 : i32
    %39 = vector.broadcast %c-1_i32 : i32 to vector<16x1xi32>
    %40 = arith.cmpi ne, %38, %39 : vector<16x1xi32>
    %41 = arith.extui %40 : vector<16x1xi1> to vector<16x1xi32>
    %42 = arith.sitofp %41 : vector<16x1xi32> to vector<16x1xf32>
    %c0_i32_19 = arith.constant 0 : i32
    %43 = vector.broadcast %c0_i32_19 : i32 to vector<16x1xi32>
    %44 = arith.addi %43, %38 : vector<16x1xi32>
    %45 = vector.broadcast %44 : vector<16x1xi32> to vector<16x128xi32>
    %46 = arith.cmpi eq, %15, %45 : vector<16x128xi32>
    %cst_20 = arith.constant 0.000000e+00 : f32
    %47 = vector.broadcast %cst_20 : f32 to vector<16x128xf32>
    %48 = arith.select %46, %14, %47 : vector<16x128xi1>, vector<16x128xf32>
    %cst_21 = arith.constant dense<0.000000e+00> : vector<16xf32>
    %49 = vector.multi_reduction <add>, %48, %cst_21 [1] : vector<16x128xf32> to vector<16xf32>
    %50 = vector.shape_cast %49 : vector<16xf32> to vector<16x1xf32>
    %51 = arith.subf %50, %27 : vector<16x1xf32>
    %52 = math.log %32 : vector<16x1xf32>
    %53 = arith.subf %51, %52 : vector<16x1xf32>
    %cst_22 = arith.constant 0.000000e+00 : f32
    %54 = vector.broadcast %cst_22 : f32 to vector<16x1xf32>
    %55 = arith.subf %54, %53 : vector<16x1xf32>
    %56 = arith.mulf %55, %42 : vector<16x1xf32>
    %57 = vector.shape_cast %56 : vector<16x1xf32> to vector<1x16x1xf32>
    %cst_23 = arith.constant dense<0.000000e+00> : vector<1xf32>
    %58 = vector.multi_reduction <add>, %57, %cst_23 [1, 2] : vector<1x16x1xf32> to vector<1xf32>
    %59 = vector.shape_cast %58 : vector<1xf32> to vector<1x1x1xf32>
    %60 = vector.extract %59[0, 0, 0] : f32 from vector<1x1x1xf32>
    %61 = vector.shape_cast %42 : vector<16x1xf32> to vector<1x16x1xf32>
    %cst_24 = arith.constant dense<0.000000e+00> : vector<1xf32>
    %62 = vector.multi_reduction <add>, %61, %cst_24 [1, 2] : vector<1x16x1xf32> to vector<1xf32>
    %63 = vector.shape_cast %62 : vector<1xf32> to vector<1x1x1xf32>
    %64 = vector.extract %63[0, 0, 0] : f32 from vector<1x1x1xf32>
    %c0_i32_25 = arith.constant 0 : i32
    %65 = vector.broadcast %c0_i32_25 : i32 to vector<8x128xi32>
    %66 = arith.cmpi eq, %16, %65 : vector<8x128xi32>
    %67 = vector.broadcast %60 : f32 to vector<8x128xf32>
    %68 = arith.select %66, %67, %18 : vector<8x128xi1>, vector<8x128xf32>
    %c1_i32 = arith.constant 1 : i32
    %69 = vector.broadcast %c1_i32 : i32 to vector<8x128xi32>
    %70 = arith.cmpi eq, %16, %69 : vector<8x128xi32>
    %71 = vector.broadcast %64 : f32 to vector<8x128xf32>
    %72 = arith.select %70, %71, %68 : vector<8x128xi1>, vector<8x128xf32>
    %c8_i32_26 = arith.constant 8 : i32
    %73 = vector.broadcast %c8_i32_26 : i32 to vector<16x128xi32>
    %74 = arith.cmpi sge, %15, %73 : vector<16x128xi32>
    %c12_i32 = arith.constant 12 : i32
    %75 = vector.broadcast %c12_i32 : i32 to vector<16x128xi32>
    %76 = arith.cmpi slt, %15, %75 : vector<16x128xi32>
    %77 = arith.andi %74, %76 : vector<16x128xi1>
    %cst_27 = arith.constant -1.000000e+30 : f32
    %78 = vector.broadcast %cst_27 : f32 to vector<16x128xf32>
    %79 = arith.select %77, %14, %78 : vector<16x128xi1>, vector<16x128xf32>
    %cst_28 = arith.constant dense<0xFF800000> : vector<16xf32>
    %80 = vector.multi_reduction <maximumf>, %79, %cst_28 [1] : vector<16x128xf32> to vector<16xf32>
    %81 = vector.shape_cast %80 : vector<16xf32> to vector<16x1xf32>
    %82 = vector.broadcast %81 : vector<16x1xf32> to vector<16x128xf32>
    %83 = arith.subf %79, %82 : vector<16x128xf32>
    %84 = math.exp %83 : vector<16x128xf32>
    %cst_29 = arith.constant dense<0.000000e+00> : vector<16xf32>
    %85 = vector.multi_reduction <add>, %84, %cst_29 [1] : vector<16x128xf32> to vector<16xf32>
    %86 = vector.shape_cast %85 : vector<16xf32> to vector<16x1xf32>
    %87 = tpu.reciprocal %86 : vector<16x1xf32> -> vector<16x1xf32>
    %88 = vector.broadcast %87 : vector<16x1xf32> to vector<16x128xf32>
    %89 = arith.mulf %84, %88 : vector<16x128xf32>
    %90 = arith.addf %36, %89 : vector<16x128xf32>
    %c1 = arith.constant 1 : index
    %c0_30 = arith.constant 0 : index
    %c0_31 = arith.constant 0 : index
    %91 = vector.load %arg6[%c1, %c0_30, %c0_31] : memref<2x16x1xi32, #tpu.memory_space<vmem>>, vector<1x16x1xi32>
    %92 = vector.shape_cast %91 : vector<1x16x1xi32> to vector<16x1xi32>
    %c-1_i32_32 = arith.constant -1 : i32
    %93 = vector.broadcast %c-1_i32_32 : i32 to vector<16x1xi32>
    %94 = arith.cmpi ne, %92, %93 : vector<16x1xi32>
    %95 = arith.extui %94 : vector<16x1xi1> to vector<16x1xi32>
    %96 = arith.sitofp %95 : vector<16x1xi32> to vector<16x1xf32>
    %c8_i32_33 = arith.constant 8 : i32
    %97 = vector.broadcast %c8_i32_33 : i32 to vector<16x1xi32>
    %98 = arith.addi %97, %92 : vector<16x1xi32>
    %99 = vector.broadcast %98 : vector<16x1xi32> to vector<16x128xi32>
    %100 = arith.cmpi eq, %15, %99 : vector<16x128xi32>
    %cst_34 = arith.constant 0.000000e+00 : f32
    %101 = vector.broadcast %cst_34 : f32 to vector<16x128xf32>
    %102 = arith.select %100, %14, %101 : vector<16x128xi1>, vector<16x128xf32>
    %cst_35 = arith.constant dense<0.000000e+00> : vector<16xf32>
    %103 = vector.multi_reduction <add>, %102, %cst_35 [1] : vector<16x128xf32> to vector<16xf32>
    %104 = vector.shape_cast %103 : vector<16xf32> to vector<16x1xf32>
    %105 = arith.subf %104, %81 : vector<16x1xf32>
    %106 = math.log %86 : vector<16x1xf32>
    %107 = arith.subf %105, %106 : vector<16x1xf32>
    %cst_36 = arith.constant 0.000000e+00 : f32
    %108 = vector.broadcast %cst_36 : f32 to vector<16x1xf32>
    %109 = arith.subf %108, %107 : vector<16x1xf32>
    %110 = arith.mulf %109, %96 : vector<16x1xf32>
    %111 = vector.shape_cast %110 : vector<16x1xf32> to vector<1x16x1xf32>
    %cst_37 = arith.constant dense<0.000000e+00> : vector<1xf32>
    %112 = vector.multi_reduction <add>, %111, %cst_37 [1, 2] : vector<1x16x1xf32> to vector<1xf32>
    %113 = vector.shape_cast %112 : vector<1xf32> to vector<1x1x1xf32>
    %114 = vector.extract %113[0, 0, 0] : f32 from vector<1x1x1xf32>
    %115 = vector.shape_cast %96 : vector<16x1xf32> to vector<1x16x1xf32>
    %cst_38 = arith.constant dense<0.000000e+00> : vector<1xf32>
    %116 = vector.multi_reduction <add>, %115, %cst_38 [1, 2] : vector<1x16x1xf32> to vector<1xf32>
    %117 = vector.shape_cast %116 : vector<1xf32> to vector<1x1x1xf32>
    %118 = vector.extract %117[0, 0, 0] : f32 from vector<1x1x1xf32>
    %c2_i32 = arith.constant 2 : i32
    %119 = vector.broadcast %c2_i32 : i32 to vector<8x128xi32>
    %120 = arith.cmpi eq, %16, %119 : vector<8x128xi32>
    %121 = vector.broadcast %114 : f32 to vector<8x128xf32>
    %122 = arith.select %120, %121, %72 : vector<8x128xi1>, vector<8x128xf32>
    %c3_i32 = arith.constant 3 : i32
    %123 = vector.broadcast %c3_i32 : i32 to vector<8x128xi32>
    %124 = arith.cmpi eq, %16, %123 : vector<8x128xi32>
    %125 = vector.broadcast %118 : f32 to vector<8x128xf32>
    %126 = arith.select %124, %125, %122 : vector<8x128xi1>, vector<8x128xf32>
    %c0_39 = arith.constant 0 : index
    %c0_40 = arith.constant 0 : index
    %127 = vector.load %arg7[%c0_39, %c0_40] : memref<16x128xf32, #tpu.memory_space<vmem>>, vector<16x128xf32>
    tpu.vector_store %arg7[%c0_39, %c0_40], %90 {strides = array<i32>} : memref<16x128xf32, #tpu.memory_space<vmem>>, vector<16x128xf32>,
    %c0_41 = arith.constant 0 : index
    %c0_42 = arith.constant 0 : index
    %c0_43 = arith.constant 0 : index
    %128 = vector.load %arg8[%c0_41, %c0_42, %c0_43] : memref<1x8x128xf32, #tpu.memory_space<vmem>>, vector<1x8x128xf32>
    %129 = vector.shape_cast %128 : vector<1x8x128xf32> to vector<8x128xf32>
    %130 = vector.shape_cast %126 : vector<8x128xf32> to vector<1x8x128xf32>
    tpu.vector_store %arg8[%c0_41, %c0_42, %c0_43], %130 {strides = array<i32>} : memref<1x8x128xf32, #tpu.memory_space<vmem>>, vector<1x8x128xf32>,
    return
  }
  func.func @transform_0(%arg0: i32) -> (i32, i32) {
    %c0_i32 = arith.constant 0 : i32
    %c0_i32_0 = arith.constant 0 : i32
    return %arg0, %c0_i32 : i32, i32
  }
  func.func @transform_1(%arg0: i32) -> (i32, i32) {
    %c0_i32 = arith.constant 0 : i32
    %c0_i32_0 = arith.constant 0 : i32
    %c0_i32_1 = arith.constant 0 : i32
    return %c0_i32, %c0_i32_0 : i32, i32
  }
  func.func @transform_2(%arg0: i32) -> (i32, i32) {
    %c0_i32 = arith.constant 0 : i32
    %c0_i32_0 = arith.constant 0 : i32
    %c0_i32_1 = arith.constant 0 : i32
    return %c0_i32, %c0_i32_0 : i32, i32
  }
  func.func @transform_3(%arg0: i32) -> (i32, i32) {
    %c0_i32 = arith.constant 0 : i32
    %c0_i32_0 = arith.constant 0 : i32
    %c0_i32_1 = arith.constant 0 : i32
    return %c0_i32, %c0_i32_0 : i32, i32
  }
  func.func @transform_4(%arg0: i32) -> (i32, i32) {
    %c0_i32 = arith.constant 0 : i32
    %c0_i32_0 = arith.constant 0 : i32
    %c0_i32_1 = arith.constant 0 : i32
    return %c0_i32, %c0_i32_0 : i32, i32
  }
  func.func @transform_5(%arg0: i32) -> (i32, i32, i32) {
    %c0_i32 = arith.constant 0 : i32
    %c0_i32_0 = arith.constant 0 : i32
    %c0_i32_1 = arith.constant 0 : i32
    return %c0_i32, %arg0, %c0_i32_0 : i32, i32, i32
  }
  func.func @transform_6(%arg0: i32) -> (i32, i32) {
    %c0_i32 = arith.constant 0 : i32
    %c0_i32_0 = arith.constant 0 : i32
    return %arg0, %c0_i32 : i32, i32
  }
  func.func @transform_7(%arg0: i32) -> (i32, i32, i32) {
    %c0_i32 = arith.constant 0 : i32
    %c0_i32_0 = arith.constant 0 : i32
    %c0_i32_1 = arith.constant 0 : i32
    return %arg0, %c0_i32, %c0_i32_0 : i32, i32, i32
  }
}

</mosaic_0001>

<bundles_post_ra>
// kernel: _fused_forward.1
= control target key start
LH: loop header
LB: loop body
LE: loop exit
PB: predicated region body
PF: predicated region fallthrough
CT: control target
= control target key end

     0   :  { %13 = vsyncpa [#allocation3], 0  ;;  %s748_s0 = inlined_call_operand.vmem [shape: f32[16,32], index: 0, kind: input, shape index: {}]   ;;  %s749_s1 = inlined_call_operand.vmem [shape: bf16[32,128], index: 1, kind: input, shape index: {}]   ;;  %s750_s2 = inlined_call_operand.vmem [shape: f32[1,128], index: 2, kind: input, shape index: {}]   ;;  %s751_s3 = inlined_call_operand.hbm [shape: bf16[128,128], index: 3, kind: input, shape index: {}]   ;;  %s752_s4 = inlined_call_operand.vmem [shape: f32[1,128], index: 4, kind: input, shape index: {}]   ;;  %s753_s5 = inlined_call_operand.vmem [shape: s32[2,16,1], index: 5, kind: input, shape index: {}]   ;;  %s754_s6 = inlined_call_operand.hbm [shape: f32[16,128], index: 6, kind: output, shape index: {0}]   ;;  %s755_s7 = inlined_call_operand.vmem [shape: f32[1,8,128], index: 7, kind: output, shape index: {1}]  }
   0x1   :  { %14 = vsyncpa [#allocation4], 0  ;;  %s593_s24 = smov [#allocation2]  }
   0x2   :  { %s26_s25 = sshll.u32 %s593_s24, 4  ;;  %s27_s25 = int_to_ptr.vmem [resolvable:$true] %s26_s25 }
   0x3   :  { %s557_s26 = scalar_lea.vmem %s27_s25, 1024  ;;  %p562_p1 = scmp.lt.s32.totalorder %s27_s25, %s27_s25 }
   0x4   :  { %p558_p0 = scmp.ne.s32.totalorder %s27_s25, %s557_s26  ;;  %p563_p2 = scmp.lt.s32.totalorder %s557_s26, %s557_s26 }
   0x6   :  { %p564_p3 = por %p563_p2, %p562_p1 }
   0x8   :  { %p565_p4 = pnand %p564_p3, %p558_p0 }
   0xa   :  { %568 = shalt.err (!%p565_p4)
}
   0xb   :  { %s594_s27 = smov 64   ;;  %s595_s28 = smov 4  }
   0xc   :  { %32 = dma.hbm_to_vmem [thread:$0]  %s751_s3, 1024, %s27_s25, [#allocation3], %s594_s27, %s594_s27, %s595_s28  }
   0xd   :  { %589 = dma.done.wait [#allocation3], 1024  }
   0xe   :  { %590 = vsyncadd [#allocation3], 4294966272  ;;  %v596_v0 = vmov 0.0   ;;  %vm597_vm0 = vmmov 0   ;;  %v515_v1 = vld [vmem:[%s749_s1 + $0x8] sm:$0xff]   ;;  %v516_v2 = vld [vmem:[%s749_s1] sm:$0xff]   ;;  %v227_v25 = vlaneseq }
   0xf   :  { %468 = vmatprep.subr.bf16.mxu0 %v596_v0  ;;  %472 = vmatprep.mubr.msk.bf16.mxu0 %vm597_vm0, %v596_v0  ;;  %v41_v3 = vld [vmem:[%s748_s0] sm:$0xff]  ;;  %v42_v4 = vld [vmem:[%s748_s0 + $0x8] sm:$0xff]  ;;  %v517_v5 = vld [vmem:[#allocation2 + $0x38] sm:$0xff]   ;;  %vm67_vm1 = vcmask 261120   ;;  %v598_v24 = vmov 0   ;;  %vm290_vm12 = vcmask 7168  }
  0x10   :  { %476 = vmatprep.subr.bf16.mxu1 %v596_v0  ;;  %492 = vmatprep.mubr.msk.bf16.mxu1 %vm597_vm0, %v596_v0  ;;  %v43_v6 = vpack.c.bf16 %v42_v4, %v41_v3  ;;  %v518_v7 = vld [vmem:[#allocation2 + $0x30] sm:$0xff]   ;;  %v519_v8 = vld [vmem:[#allocation2 + $0x28] sm:$0xff]   ;;  %v520_v9 = vld [vmem:[#allocation2 + $0x20] sm:$0xff]   ;;  %v673_v26 = vand.u32 127, %v227_v25 }
  0x11   :  { %469 = vmatpush3.bf16.msra.mxu0 %v515_v1  ;;  %477 = vmatpush3.bf16.msra.mxu1 %v517_v5  ;;  %v521_v10 = vld [vmem:[#allocation2 + $0x18] sm:$0xff]   ;;  %v522_v11 = vld [vmem:[#allocation2 + $0x10] sm:$0xff]   ;;  %v523_v12 = vld [vmem:[#allocation2 + $0x8] sm:$0xff]  }
  0x12   :  { %470 = vmatprep.subr.bf16.mxu0 %v596_v0  ;;  %478 = vmatprep.subr.bf16.mxu1 %v596_v0  ;;  %v524_v13 = vld [vmem:[#allocation2] sm:$0xff]   ;;  %vm321_vm2 = vcmp.ge.s32.totalorder %v673_v26, 8  ;;  %vm322_vm3 = vcmp.lt.s32.totalorder %v673_v26, 12  ;;  %vm232_vm5 = vcmp.lt.s32.totalorder %v673_v26, 8  ;;  %v257_v38 = vld [vmem:[%s753_s5 + $0x8] sm:$0xff]  ;;  %v452_v41 = vld [vmem:[%s753_s5 + $0x10] sm:$0xff] }
  0x13   :  { %v437_v14 = vld [vmem:[%s750_s2] ss:$0 sm:$0xff]  ;;  %514 = vset.pattern.permute.xlu1 %v598_v24  ;;  %513 = vset.pattern.permute.xlu0 %v598_v24  ;;  %vm680_vm4 = vmand %vm321_vm2, %vm322_vm3  ;;  %v355_v42 = vadd.s32 8, %v452_v41  ;;  %v453_v43 = vld [vmem:[%s753_s5 + $0x18] sm:$0xff]  ;;  %vm259_vm10 = vcmp.ne.s32.totalorder %v257_v38, 4294967295  ;;  %vm349_vm13 = vcmp.ne.s32.totalorder %v452_v41, 4294967295 }
  0x14   :  { %v441_v27 = vld [vmem:[%s752_s4] ss:$0 sm:$0xff]  ;;  %v356_v44 = vadd.s32 8, %v453_v43  ;;  %vm350_vm14 = vcmp.ne.s32.totalorder %v453_v43, 4294967295 }
  0x15   :  { %471 = vmatpush3.bf16.msra.mxu0 %v516_v2  ;;  %479 = vmatpush3.bf16.msra.mxu1 %v518_v7  ;;  %v256_v39 = vld [vmem:[%s753_s5] sm:$0xff]  ;;  %v451_v7 = vsel %vm259_vm10, 1.0, %v596_v0  ;;  %s599_s5 = smov [#allocation5]  }
  0x16   :  { %480 = vmatprep.subr.bf16.mxu1 %v596_v0  ;;  %vm258_vm11 = vcmp.ne.s32.totalorder %v256_v39, 4294967295  ;;  %s421_s23 = sshll.u32 %s599_s5, 4  ;;  %s422_s23 = int_to_ptr.vmem [resolvable:$true] %s421_s23 }
  0x17   :  { %s569_s24 = scalar_lea.vmem %s422_s23, 256  ;;  %p574_p6 = scmp.lt.s32.totalorder %s422_s23, %s422_s23 }
  0x18   :  { %473 = vmatmul.mubr.msk.bf16.vlgmr.msra.gmra.mxu0 %vm67_vm1, %v43_v6  ;;  %v450_v6 = vsel %vm258_vm11, 1.0, %v596_v0  ;;  %p570_p5 = scmp.ne.s32.totalorder %s422_s23, %s569_s24  ;;  %p575_p7 = scmp.lt.s32.totalorder %s569_s24, %s569_s24 }
  0x19   :  { %481 = vmatpush3.bf16.msra.mxu1 %v519_v8  ;;  %v303_v8 = vsel %vm290_vm12, %v450_v6, 0.0 }
  0x1a   :  { %482 = vmatprep.subr.bf16.mxu1 %v596_v0  ;;  %p576_p8 = por %p575_p7, %p574_p6 }
  0x1c   :  { %p577_p9 = pnand %p576_p8, %p570_p5 }
  0x1d   :  { %483 = vmatpush3.bf16.msra.mxu1 %v520_v9  ;;  %v304_v9 = vsel %vm290_vm12, %v451_v7, 0.0 }
  0x1e   :  { %484 = vmatprep.subr.bf16.mxu1 %v596_v0 }
  0x21   :  { %485 = vmatpush3.bf16.msra.mxu1 %v521_v10  ;;  %v305_v10 = vadd.f32 %v304_v9, %v303_v8 }
  0x22   :  { %486 = vmatprep.subr.bf16.mxu1 %v596_v0 }
  0x25   :  { %487 = vmatpush3.bf16.msra.mxu1 %v522_v11  ;;  %v454_v11 = vsel %vm349_vm13, 1.0, %v596_v0 }
  0x26   :  { %488 = vmatprep.subr.bf16.mxu1 %v596_v0 }
  0x29   :  { %489 = vmatpush3.bf16.msra.mxu1 %v523_v12  ;;  %v455_v12 = vsel %vm350_vm14, 1.0, %v596_v0 }
  0x2a   :  { %490 = vmatprep.subr.bf16.mxu1 %v596_v0 }
  0x2d   :  { %491 = vmatpush3.bf16.msra.mxu1 %v524_v13  ;;  %v395_v13 = vsel %vm290_vm12, %v454_v11, 0.0 }
  0xd8   :  { %v105_v15 = vpop.f32.mrf.mxu0 }
  0xd9   :  { %v106_v17 = vadd.f32 %v437_v14, %v105_v15 }
  0xda   :  { %v474_v16 = vpop.f32.mrf.mxu0 }
  0xdb   :  { %v112_v21 = vmax.f32 %v106_v17, 0.0 }
  0xdc   :  { %v108_v18 = vpop.f32.mrf.mxu0 }
  0xdd   :  { %v109_v19 = vadd.f32 %v437_v14, %v108_v18  ;;  %v396_v14 = vsel %vm290_vm12, %v455_v12, 0.0 }
  0xde   :  { %v475_v20 = vpop.f32.mrf.mxu0  ;;  %v397_v15 = vadd.f32 %v396_v14, %v395_v13 }
  0xdf   :  { %v113_v22 = vmax.f32 %v109_v19, 0.0 }
  0xe1   :  { %v114_v23 = vpack.c.bf16 %v113_v22, %v112_v21 }
  0xe3   :  { %493 = vmatmul.mubr.bf16.vlgmr.msra.gmra.mxu1 %v114_v23 }
 0x1a3   :  { %v220_v28 = vpop.f32.mrf.mxu1 }
 0x1a4   :  { %v221_v30 = vadd.f32 %v441_v27, %v220_v28 }
 0x1a5   :  { %v494_v31 = vpop.f32.mrf.mxu1 }
 0x1a6   :  { %v324_v32 = vsel %vm680_vm4, %v221_v30, -1e+30  ;;  %v234_v33 = vsel %vm232_vm5, %v221_v30, -1e+30 }
 0x1a7   :  { %326 = vmax.xlane.f32.xlu1 %v324_v32  ;;  %236 = vmax.xlane.f32.xlu0 %v234_v33  ;;  %v223_v34 = vpop.f32.mrf.mxu1 }
 0x1a8   :  { %v224_v35 = vadd.f32 %v441_v27, %v223_v34 }
 0x1a9   :  { %v495_v36 = vpop.f32.mrf.mxu1 }
 0x1aa   :  { %v235_v37 = vsel %vm232_vm5, %v224_v35, -1e+30  ;;  %v325_v40 = vsel %vm680_vm4, %v224_v35, -1e+30 }
 0x1ab   :  { %238 = vmax.xlane.f32.xlu0 %v235_v37 }
 0x1b8   :  { %268 = vperm.xlu1 %514, %v257_v38  }
 0x1c1   :  { %265 = vperm.xlu0 %513, %v256_v39  }
 0x1dc   :  { %328 = vmax.xlane.f32.xlu1 %v325_v40 }
 0x1ed   :  { %358 = vperm.xlu1 %514, %v355_v42  }
 0x1f1   :  { %361 = vperm.xlu1 %514, %v356_v44  }
 0x230   :  { %v701_v45 = vpop.xlane.xlu1 %326  ;;  %v703_v46 = vpop.xlane.xlu0 %236 }
 0x231   :  { %v240_v47 = vsub.f32 %v234_v33, %v703_v46  ;;  %v330_v48 = vsub.f32 %v324_v32, %v701_v45 }
 0x233   :  { %v242_v49 = vmul.f32 1.442695, %v240_v47  ;;  %v332_v52 = vmul.f32 1.442695, %v330_v48 }
 0x234   :  { %v707_v50 = vpop.xlane.xlu0 %238  ;;  %v269_v57 = vpop.permute.xlu1 %268 }
 0x235   :  { %v241_v51 = vsub.f32 %v235_v37, %v707_v50  ;;  %525 = vpow2.f32 %v242_v49  ;;  %vm271_vm8 = vcmp.eq.s32.totalorder %v673_v26, %v269_v57 }
 0x236   :  { %v273_v4 = vsel %vm271_vm8, %v224_v35, 0.0 }
 0x237   :  { %v244_v53 = vmul.f32 1.442695, %v241_v51 }
 0x239   :  { %527 = vpow2.f32 %v244_v53 }
 0x23a   :  { %529 = vpow2.f32 %v332_v52 }
 0x23c   :  { %v266_v63 = vpop.permute.xlu0 %265 }
 0x23d   :  { %vm270_vm7 = vcmp.eq.s32.totalorder %v673_v26, %v266_v63 }
 0x23e   :  { %v272_v2 = vsel %vm270_vm7, %v221_v30, 0.0 }
 0x242   :  { %v526_v54 = vpop.eup %525 }
 0x243   :  { %246 = vadd.xlane.f32.xlu1 %v526_v54 }
 0x246   :  { %v710_v55 = vpop.eup %527 }
 0x247   :  { %v530_v56 = vpop.eup %529  ;;  %248 = vadd.xlane.f32.xlu0 %v710_v55 }
 0x248   :  { %336 = vadd.xlane.f32.xlu1 %v530_v56 }
 0x265   :  { %v713_v58 = vpop.xlane.xlu1 %328 }
 0x266   :  { %v331_v59 = vsub.f32 %v325_v40, %v713_v58 }
 0x268   :  { %v334_v60 = vmul.f32 1.442695, %v331_v59 }
 0x269   :  { %v359_v61 = vpop.permute.xlu1 %358 }
 0x26a   :  { %531 = vpow2.f32 %v334_v60  ;;  %vm363_vm6 = vcmp.eq.s32.totalorder %v673_v26, %v359_v61 }
 0x26b   :  { %v365_v62 = vsel %vm363_vm6, %v221_v30, 0.0 }
 0x26c   :  { %367 = vadd.xlane.f32.xlu0 %v365_v62 }
 0x26d   :  { %v362_v3 = vpop.permute.xlu1 %361 }
 0x26e   :  { %vm364_vm9 = vcmp.eq.s32.totalorder %v673_v26, %v362_v3 }
 0x26f   :  { %v366_v5 = vsel %vm364_vm9, %v224_v35, 0.0 }
 0x277   :  { %v717_v1 = vpop.eup %531 }
 0x278   :  { %338 = vadd.xlane.f32.xlu1 %v717_v1 }
 0x27c   :  { %274 = vadd.xlane.f32.xlu1 %v272_v2 }
 0x280   :  { %276 = vadd.xlane.f32.xlu1 %v273_v4 }
 0x284   :  { %369 = vadd.xlane.f32.xlu1 %v366_v5 }
 0x288   :  { %306 = vadd.xlane.f32.xlu1 %v305_v10 }
 0x28c   :  { %398 = vadd.xlane.f32.xlu1 %v397_v15 }
 0x2cc   :  { %v247_v16 = vpop.xlane.xlu1 %246 }
 0x2cd   :  { %533 = vrcp.f32 %v247_v16 }
 0x2d0   :  { %v249_v23 = vpop.xlane.xlu0 %248 }
 0x2d1   :  { %v337_v17 = vpop.xlane.xlu1 %336 }
 0x2d2   :  { %535 = vrcp.f32 %v337_v17 }
 0x2d3   :  { %537 = vlog2.f32 %v247_v16 }
 0x2d4   :  { %539 = vlog2.f32 %v249_v23 }
 0x2d5   :  { %541 = vlog2.f32 %v337_v17 }
 0x2d6   :  { %543 = vrcp.f32 %v249_v23 }
 0x2da   :  { %v534_v18 = vpop.eup %533 }
 0x2db   :  { %v252_v20 = vmul.f32 %v534_v18, %v526_v54 }
 0x2df   :  { %v536_v19 = vpop.eup %535 }
 0x2e0   :  { %v342_v21 = vmul.f32 %v536_v19, %v530_v56  ;;  %v538_v24 = vpop.eup %537 }
 0x2e1   :  { %v281_v28 = vmul.f32 0.6931472, %v538_v24  ;;  %v540_v30 = vpop.eup %539 }
 0x2e2   :  { %v344_v22 = vadd.f32 %v342_v21, %v252_v20  ;;  %v542_v31 = vpop.eup %541  ;;  %v283_v37 = vmul.f32 0.6931472, %v540_v30 }
 0x2e3   :  { %v374_v38 = vmul.f32 0.6931472, %v542_v31  ;;  %v544_v40 = vpop.eup %543 }
 0x2e4   :  { %413 = vst [vmem:[#allocation5] sm:$0xff] %v344_v22  ;;  %v253_v49 = vmul.f32 %v544_v40, %v710_v55 }
 0x2f5   :  { %v368_v27 = vpop.xlane.xlu0 %367 }
 0x2f6   :  { %v371_v33 = vsub.f32 %v368_v27, %v701_v45 }
 0x2f8   :  { %v377_v41 = vsub.f32 %v371_v33, %v374_v38 }
 0x2fa   :  { %v379_v45 = vsub.f32 0.0, %v377_v41 }
 0x2fc   :  { %v381_v61 = vmul.f32 %v454_v11, %v379_v45 }
 0x2fe   :  { %v383_v55 = vsel %vm290_vm12, %v381_v61, 0.0 }
 0x301   :  { %v339_v0 = vpop.xlane.xlu1 %338 }
 0x302   :  { %545 = vrcp.f32 %v339_v0 }
 0x303   :  { %547 = vlog2.f32 %v339_v0 }
 0x305   :  { %v275_v26 = vpop.xlane.xlu1 %274 }
 0x306   :  { %v278_v29 = vsub.f32 %v275_v26, %v703_v46 }
 0x308   :  { %v284_v32 = vsub.f32 %v278_v29, %v281_v28 }
 0x309   :  { %v277_v34 = vpop.xlane.xlu1 %276 }
 0x30a   :  { %v286_v35 = vsub.f32 0.0, %v284_v32  ;;  %v279_v36 = vsub.f32 %v277_v34, %v707_v50 }
 0x30c   :  { %v285_v39 = vsub.f32 %v279_v36, %v283_v37  ;;  %v288_v44 = vmul.f32 %v450_v6, %v286_v35 }
 0x30d   :  { %v370_v43 = vpop.xlane.xlu1 %369 }
 0x30e   :  { %v287_v42 = vsub.f32 0.0, %v285_v39  ;;  %v372_v53 = vsub.f32 %v370_v43, %v713_v58  ;;  %v291_v50 = vsel %vm290_vm12, %v288_v44, 0.0 }
 0x30f   :  { %v546_v47 = vpop.eup %545 }
 0x310   :  { %v548_v48 = vpop.eup %547  ;;  %v289_v46 = vmul.f32 %v451_v7, %v287_v42  ;;  %v343_v51 = vmul.f32 %v546_v47, %v717_v1 }
 0x311   :  { %v376_v52 = vmul.f32 0.6931472, %v548_v48 }
 0x312   :  { %v292_v54 = vsel %vm290_vm12, %v289_v46, 0.0  ;;  %v345_v56 = vadd.f32 %v343_v51, %v253_v49 }
 0x313   :  { %v378_v57 = vsub.f32 %v372_v53, %v376_v52  ;;  %v293_v59 = vadd.f32 %v292_v54, %v291_v50 }
 0x314   :  { %414 = vst [vmem:[#allocation5 + $0x8] sm:$0xff] %v345_v56 }
 0x315   :  { %v380_v60 = vsub.f32 0.0, %v378_v57  ;;  %294 = vadd.xlane.f32.xlu0 %v293_v59 }
 0x317   :  { %v382_v62 = vmul.f32 %v455_v12, %v380_v60 }
 0x319   :  { %v384_v63 = vsel %vm290_vm12, %v382_v62, 0.0 }
 0x31a   :  { %v385_v1 = vadd.f32 %v384_v63, %v383_v55 }
 0x31c   :  { %386 = vadd.xlane.f32.xlu0 %v385_v1 }
 0x31d   :  { %580 = shalt.err (!%p577_p9)
}
 0x31e   :  { %s600_s25 = smov 128   ;;  %s601_s26 = smov 8   ;;  %v307_v58 = vpop.xlane.xlu1 %306  ;;  %v230_v29 = vshrl.u32 %v227_v25, 7 }
 0x31f   :  { %427 = dma.vmem_to_hbm [thread:$0]  %s422_s23, 256, %s754_s6, [#allocation4], %s600_s25, %s600_s25, %s601_s26   ;;  %v308_v2 = vrot.slane %v307_v58, 4 }
 0x320   :  { %vm315_vm15 = vcmp.eq.s32.totalorder %v230_v29, 0  ;;  %vm318_vm0 = vcmp.eq.s32.totalorder %v230_v29, 1  ;;  %vm407_vm1 = vcmp.eq.s32.totalorder %v230_v29, 2  ;;  %vm410_vm2 = vcmp.eq.s32.totalorder %v230_v29, 3 }
 0x321   :  { %v309_v3 = vadd.f32 %v308_v2, %v307_v58 }
 0x322   :  { %v399_v4 = vpop.xlane.xlu1 %398 }
 0x323   :  { %v400_v5 = vrot.slane %v399_v4, 4  ;;  %v310_v6 = vrot.slane %v309_v3, 2 }
 0x325   :  { %v401_v10 = vadd.f32 %v400_v5, %v399_v4  ;;  %v311_v11 = vadd.f32 %v310_v6, %v309_v3 }
 0x327   :  { %v402_v13 = vrot.slane %v401_v10, 2  ;;  %v312_v17 = vrot.slane %v311_v11, 1 }
 0x329   :  { %v403_v20 = vadd.f32 %v402_v13, %v401_v10  ;;  %v313_v23 = vadd.f32 %v312_v17, %v311_v11 }
 0x32b   :  { %v404_v24 = vrot.slane %v403_v20, 1 }
 0x32d   :  { %v405_v28 = vadd.f32 %v404_v24, %v403_v20 }
 0x39e   :  { %v295_v7 = vpop.xlane.xlu0 %294 }
 0x39f   :  { %v296_v8 = vrot.slane %v295_v7, 4 }
 0x3a1   :  { %v297_v9 = vadd.f32 %v296_v8, %v295_v7 }
 0x3a3   :  { %v298_v12 = vrot.slane %v297_v9, 2 }
 0x3a5   :  { %v387_v14 = vpop.xlane.xlu0 %386  ;;  %v299_v15 = vadd.f32 %v298_v12, %v297_v9 }
 0x3a6   :  { %v388_v16 = vrot.slane %v387_v14, 4 }
 0x3a7   :  { %v300_v18 = vrot.slane %v299_v15, 1 }
 0x3a8   :  { %v389_v19 = vadd.f32 %v388_v16, %v387_v14 }
 0x3a9   :  { %v301_v21 = vadd.f32 %v300_v18, %v299_v15 }
 0x3aa   :  { %v390_v22 = vrot.slane %v389_v19, 2 }
 0x3ab   :  { %496 = vpush %v301_v21 }
 0x3ac   :  { %v391_v0 = vadd.f32 %v390_v22, %v389_v19  ;;  %498 = vpush %v313_v23 }
 0x3ae   :  { %v392_v26 = vrot.slane %v391_v0, 1 }
 0x3b0   :  { %v393_v27 = vadd.f32 %v392_v26, %v391_v0 }
 0x3b2   :  { %500 = vpush %v393_v27 }
 0x3b3   :  { %502 = vpush %v405_v28 }
 0x3dc   :  { %s497_s6 = spop %496 }
 0x3dd   :  { %v316_v30 = vstv %s497_s6  ;;  %s499_s29 = spop %498 }
 0x3de   :  { %v317_v31 = vsel %vm315_vm15, %v316_v30, 0.0  ;;  %v319_v32 = vstv %s499_s29 }
 0x3df   :  { %v320_v33 = vsel %vm318_vm0, %v319_v32, %v317_v31 }
 0x3e3   :  { %s501_s30 = spop %500 }
 0x3e4   :  { %v408_v34 = vstv %s501_s30  ;;  %s503_s8 = spop %502 }
 0x3e5   :  { %v409_v35 = vsel %vm407_vm1, %v408_v34, %v320_v33  ;;  %v411_v36 = vstv %s503_s8 }
 0x3e6   :  { %v412_v37 = vsel %vm410_vm2, %v411_v36, %v409_v35 }
 0x3e7   :  { %415 = vst [vmem:[%s755_s7] sm:$0xff] %v412_v37 }
 0x3e8   :  { %591 = dma.done.wait [#allocation4], 256  }
 0x3e9   :  { %592 = vsyncadd [#allocation4], 4294967040 }
 0x3ea   :  { %435 = vsyncpa [#allocation3], 1 }
 0x3eb   :  { %436 = vsyncpa [#allocation4], 1 }

</bundles_post_ra>
